<compile_context>
chip_gen: v5e
topology: v5e:2x2
jax: 0.10.0
libtpu: 0.0.40
codegen_flags: <defaults>
</compile_context>

<pallas_src>
import jax
import jax.numpy as jnp
from jax.experimental import pallas as pl
from jax.experimental.pallas import tpu as pltpu


# ---------------------------------------------------------------------------
# Fused kernel: 3x (SAGEConv + BN(eval) + ReLU) + global_max_pool + Linear
# ---------------------------------------------------------------------------
def gcn_fused_kernel(a_ref, x_ref,
                     w1_ref, c1_ref,
                     w2_ref, c2_ref,
                     w3_ref, c3_ref,
                     negmask_ref, wlin_ref, blin_ref,
                     o_ref, pooled_scratch):
    a = a_ref[...]                       # (N, N) bf16 row-normalized adjacency
    x = x_ref[...]                       # (N, Cin) bf16

    def sage_layer(h_lo, w_ref, c_ref, relu):
        # One fused projection matmul: t_all = h @ [Wl | Wr]  (bf16 in, f32 acc)
        t_all = jnp.dot(h_lo, w_ref[...], preferred_element_type=jnp.float32)  # (N, 2C)
        c = t_all.shape[1] // 2
        t_l = t_all[:, :c]               # aggregation path (A @ (h @ Wl))
        t_r = t_all[:, c:]               # self / root path   (h @ Wr)
        # Mean aggregation: single-pass bf16 MXU matmul, f32 accumulation.
        agg = jnp.dot(a, t_l.astype(jnp.bfloat16),
                      preferred_element_type=jnp.float32)                      # (N, C)
        # BN(eval) + conv bias already folded into Wcat / c.  f32 epilogue.
        h = agg + t_r + c_ref[...]
        if relu:
            h = jnp.maximum(h, 0.0)
        return h

    h = sage_layer(x, w1_ref, c1_ref, relu=True)
    h = sage_layer(h.astype(jnp.bfloat16), w2_ref, c2_ref, relu=True)
    h = sage_layer(h.astype(jnp.bfloat16), w3_ref, c3_ref, relu=False)

    # global_max_pool: per-graph masked max over the node (sublane) axis using
    # an additive mask (0 for members, -3e38 otherwise).  Rows land in a
    # (G, C) VMEM scratch (no cross-sublane concatenate).
    # NOTE: a graph id with zero member nodes yields the -3e38 sentinel row
    # (same behavior as the dense-mask reference implementation).
    negmask = negmask_ref[...]           # (N, G) f32
    num_graphs = negmask.shape[1]
    for g in range(num_graphs):          # G is tiny and static -> unrolled
        pooled_scratch[g] = jnp.max(h + negmask[:, g:g + 1], axis=0)

    # TODO(synk): dropout(p=0.1675) is identity in eval mode; not applied.
    o_ref[...] = (jnp.dot(pooled_scratch[...], wlin_ref[...],
                          preferred_element_type=jnp.float32)
                  + blin_ref[...])


def gcn_forward_fused(adj_bf16, x_bf16, p, neg_mask):
    num_graphs = neg_mask.shape[1]
    hidden = p["wlin"].shape[0]
    num_classes = p["wlin"].shape[1]
    vmem = pl.BlockSpec(memory_space=pltpu.MemorySpace.VMEM)
    args = (adj_bf16, x_bf16,
            p["w1"], p["c1"],
            p["w2"], p["c2"],
            p["w3"], p["c3"],
            neg_mask, p["wlin"], p["blin"])
    return pl.pallas_call(
        gcn_fused_kernel,
        out_shape=jax.ShapeDtypeStruct((num_graphs, num_classes), jnp.float32),
        in_specs=[vmem] * len(args),
        out_specs=vmem,
        scratch_shapes=[pltpu.VMEM((num_graphs, hidden), jnp.float32)],
    )(*args)


# ---------------------------------------------------------------------------
# One-time (hoisted) host-side preprocessing
# ---------------------------------------------------------------------------
def build_mean_adj(edge_index, n):
    """Dense row-normalized adjacency in bf16: A[t, s] = 1/deg_in(t) for s->t."""
    src, tgt = edge_index[0], edge_index[1]
    adj = jnp.zeros((n, n), jnp.float32).at[tgt, src].add(1.0)
    deg = jnp.maximum(adj.sum(axis=1, keepdims=True), 1.0)
    return (adj / deg).astype(jnp.bfloat16)


def build_neg_mask(batch, num_graphs):
    """Additive pooling mask: 0.0 where batch[n] == g, -3e38 otherwise."""
    member = batch[:, None] == jnp.arange(num_graphs, dtype=batch.dtype)[None, :]
    return jnp.where(member, 0.0, -3.0e38).astype(jnp.float32)


def prepare_params(params):
    """Fold eval-mode BatchNorm + conv bias into the weights, concatenate each
    layer's Wl|Wr into one (Cin, 2C) matrix, cast MXU operands to bf16
    (folding done in f32 first)."""
    p = {}
    for i in (1, 2, 3):
        conv, bn = params[f"conv{i}"], params[f"bn{i}"]
        scale = bn["weight"] / jnp.sqrt(bn["running_var"] + 1e-5)       # (C,)
        shift = bn["bias"] - bn["running_mean"] * scale                 # (C,)
        wl = conv["w_l"] * scale[None, :]
        wr = conv["w_r"] * scale[None, :]
        p[f"w{i}"] = jnp.concatenate([wl, wr], axis=1).astype(jnp.bfloat16)   # (Cin, 2C)
        p[f"c{i}"] = (conv["bias"] * scale[None, :] + shift[None, :]).astype(jnp.float32)
    p["wlin"] = params["lin"]["w"].astype(jnp.float32)   # tiny head: keep f32
    p["blin"] = params["lin"]["b"].astype(jnp.float32)
    return p


# ---------------------------------------------------------------------------
# Deterministic parameter construction (synthetic, matches module shapes)
# ---------------------------------------------------------------------------
def init_params(key, in_channels=768, hidden=32, num_classes=11):
    keys = jax.random.split(key, 16)
    k = iter(keys)

    def lin_w(rng, fan_in, fan_out):
        return (jax.random.normal(rng, (fan_in, fan_out), jnp.float32)
                * (1.0 / jnp.sqrt(fan_in)))

    params = {}
    dims = [(in_channels, hidden), (hidden, hidden), (hidden, hidden)]
    for i, (ci, co) in enumerate(dims, start=1):
        params[f"conv{i}"] = {
            "w_l": lin_w(next(k), ci, co),            # lin_l (aggregated neighbors)
            "w_r": lin_w(next(k), ci, co),            # lin_r (root / self)
            "bias": jax.random.normal(next(k), (1, co), jnp.float32) * 0.01,
        }
        params[f"bn{i}"] = {
            "weight": jnp.ones((co,), jnp.float32),
            "bias": jnp.zeros((co,), jnp.float32),
            "running_mean": jnp.zeros((co,), jnp.float32),
            "running_var": jnp.ones((co,), jnp.float32),
        }
    params["lin"] = {
        "w": lin_w(next(k), hidden, num_classes),
        "b": jax.random.normal(next(k), (1, num_classes), jnp.float32) * 0.01,
    }
    return params


if __name__ == "__main__":
    key = jax.random.PRNGKey(0)
    k_x, k_e, k_p = jax.random.split(key, 3)

    N = 16            # nodes
    E = 40            # edges
    IN = 768          # input feature dim (fixed by module)
    HIDDEN = 32
    NUM_GRAPHS = 2
    NUM_CLASSES = 11

    x = jax.random.normal(k_x, (N, IN), jnp.float32)
    edge_index = jax.random.randint(k_e, (2, E), 0, N, jnp.int32)
    batch = jnp.concatenate([jnp.zeros(N // 2, jnp.int32),
                             jnp.ones(N - N // 2, jnp.int32)])

    params = init_params(k_p, IN, HIDDEN, NUM_CLASSES)

    # Hoisted one-time prep (off the per-forward hot path).
    adj = build_mean_adj(edge_index, N)                  # bf16 (N, N)
    neg_mask = build_neg_mask(batch, NUM_GRAPHS)         # f32  (N, G)
    prepped = prepare_params(params)
    x_bf16 = x.astype(jnp.bfloat16)

    fwd = jax.jit(gcn_forward_fused)
    out = jax.block_until_ready(fwd(adj, x_bf16, prepped, neg_mask))
    assert out.shape == (NUM_GRAPHS, NUM_CLASSES)
    assert bool(jnp.all(jnp.isfinite(out)))
    print("KERNEL_OK")
</pallas_src>

<mosaic_0001>
module attributes {stable_mosaic.version = 11 : i64} {
  func.func @gcn_fused_kernel(%arg0: memref<16x16xbf16, #tpu.memory_space<vmem>>, %arg1: memref<16x768xbf16, #tpu.memory_space<vmem>>, %arg2: memref<768x64xbf16, #tpu.memory_space<vmem>>, %arg3: memref<1x32xf32, #tpu.memory_space<vmem>>, %arg4: memref<32x64xbf16, #tpu.memory_space<vmem>>, %arg5: memref<1x32xf32, #tpu.memory_space<vmem>>, %arg6: memref<32x64xbf16, #tpu.memory_space<vmem>>, %arg7: memref<1x32xf32, #tpu.memory_space<vmem>>, %arg8: memref<16x2xf32, #tpu.memory_space<vmem>>, %arg9: memref<32x11xf32, #tpu.memory_space<vmem>>, %arg10: memref<1x11xf32, #tpu.memory_space<vmem>>, %arg11: memref<2x11xf32, #tpu.memory_space<vmem>>, %arg12: memref<2x32xf32, #tpu.memory_space<vmem>>) attributes {dimension_semantics = [], scalar_prefetch = 0 : i64, scratch_operands = 1 : i64, tpu.core_type = #tpu.core_type<tc>} {
    %c0 = arith.constant 0 : index
    %c0_0 = arith.constant 0 : index
    %0 = vector.load %arg0[%c0, %c0_0] : memref<16x16xbf16, #tpu.memory_space<vmem>>, vector<16x16xbf16>
    %c0_1 = arith.constant 0 : index
    %c0_2 = arith.constant 0 : index
    %1 = vector.load %arg1[%c0_1, %c0_2] : memref<16x768xbf16, #tpu.memory_space<vmem>>, vector<16x768xbf16>
    %c0_3 = arith.constant 0 : index
    %c0_4 = arith.constant 0 : index
    %2 = vector.load %arg2[%c0_3, %c0_4] : memref<768x64xbf16, #tpu.memory_space<vmem>>, vector<768x64xbf16>
    %cst = arith.constant dense<0.000000e+00> : vector<16x64xf32>
    %3 = tpu.matmul %1, %2, %cst {dimension_numbers = #tpu.dot_dimension_numbers<[1], [0], [0], [1], [0, 0, 1, 1], [], []>} : vector<16x768xbf16>, vector<768x64xbf16>, vector<16x64xf32> -> vector<16x64xf32>
    %4 = vector.extract_strided_slice %3 {offsets = [0, 0], sizes = [16, 32], strides = [1, 1]} : vector<16x64xf32> to vector<16x32xf32>
    %5 = vector.extract_strided_slice %3 {offsets = [0, 32], sizes = [16, 32], strides = [1, 1]} : vector<16x64xf32> to vector<16x32xf32>
    %6 = arith.truncf %4 : vector<16x32xf32> to vector<16x32xbf16>
    %cst_5 = arith.constant dense<0.000000e+00> : vector<16x32xf32>
    %7 = tpu.matmul %0, %6, %cst_5 {dimension_numbers = #tpu.dot_dimension_numbers<[1], [0], [0], [1], [0, 0, 1, 1], [], []>} : vector<16x16xbf16>, vector<16x32xbf16>, vector<16x32xf32> -> vector<16x32xf32>
    %8 = arith.addf %7, %5 : vector<16x32xf32>
    %c0_6 = arith.constant 0 : index
    %c0_7 = arith.constant 0 : index
    %9 = vector.load %arg3[%c0_6, %c0_7] : memref<1x32xf32, #tpu.memory_space<vmem>>, vector<1x32xf32>
    %10 = vector.broadcast %9 : vector<1x32xf32> to vector<16x32xf32>
    %11 = arith.addf %8, %10 : vector<16x32xf32>
    %cst_8 = arith.constant 0.000000e+00 : f32
    %12 = vector.broadcast %cst_8 : f32 to vector<16x32xf32>
    %13 = arith.maximumf %11, %12 : vector<16x32xf32>
    %14 = arith.truncf %13 : vector<16x32xf32> to vector<16x32xbf16>
    %c0_9 = arith.constant 0 : index
    %c0_10 = arith.constant 0 : index
    %15 = vector.load %arg4[%c0_9, %c0_10] : memref<32x64xbf16, #tpu.memory_space<vmem>>, vector<32x64xbf16>
    %cst_11 = arith.constant dense<0.000000e+00> : vector<16x64xf32>
    %16 = tpu.matmul %14, %15, %cst_11 {dimension_numbers = #tpu.dot_dimension_numbers<[1], [0], [0], [1], [0, 0, 1, 1], [], []>} : vector<16x32xbf16>, vector<32x64xbf16>, vector<16x64xf32> -> vector<16x64xf32>
    %17 = vector.extract_strided_slice %16 {offsets = [0, 0], sizes = [16, 32], strides = [1, 1]} : vector<16x64xf32> to vector<16x32xf32>
    %18 = vector.extract_strided_slice %16 {offsets = [0, 32], sizes = [16, 32], strides = [1, 1]} : vector<16x64xf32> to vector<16x32xf32>
    %19 = arith.truncf %17 : vector<16x32xf32> to vector<16x32xbf16>
    %cst_12 = arith.constant dense<0.000000e+00> : vector<16x32xf32>
    %20 = tpu.matmul %0, %19, %cst_12 {dimension_numbers = #tpu.dot_dimension_numbers<[1], [0], [0], [1], [0, 0, 1, 1], [], []>} : vector<16x16xbf16>, vector<16x32xbf16>, vector<16x32xf32> -> vector<16x32xf32>
    %21 = arith.addf %20, %18 : vector<16x32xf32>
    %c0_13 = arith.constant 0 : index
    %c0_14 = arith.constant 0 : index
    %22 = vector.load %arg5[%c0_13, %c0_14] : memref<1x32xf32, #tpu.memory_space<vmem>>, vector<1x32xf32>
    %23 = vector.broadcast %22 : vector<1x32xf32> to vector<16x32xf32>
    %24 = arith.addf %21, %23 : vector<16x32xf32>
    %cst_15 = arith.constant 0.000000e+00 : f32
    %25 = vector.broadcast %cst_15 : f32 to vector<16x32xf32>
    %26 = arith.maximumf %24, %25 : vector<16x32xf32>
    %27 = arith.truncf %26 : vector<16x32xf32> to vector<16x32xbf16>
    %c0_16 = arith.constant 0 : index
    %c0_17 = arith.constant 0 : index
    %28 = vector.load %arg6[%c0_16, %c0_17] : memref<32x64xbf16, #tpu.memory_space<vmem>>, vector<32x64xbf16>
    %cst_18 = arith.constant dense<0.000000e+00> : vector<16x64xf32>
    %29 = tpu.matmul %27, %28, %cst_18 {dimension_numbers = #tpu.dot_dimension_numbers<[1], [0], [0], [1], [0, 0, 1, 1], [], []>} : vector<16x32xbf16>, vector<32x64xbf16>, vector<16x64xf32> -> vector<16x64xf32>
    %30 = vector.extract_strided_slice %29 {offsets = [0, 0], sizes = [16, 32], strides = [1, 1]} : vector<16x64xf32> to vector<16x32xf32>
    %31 = vector.extract_strided_slice %29 {offsets = [0, 32], sizes = [16, 32], strides = [1, 1]} : vector<16x64xf32> to vector<16x32xf32>
    %32 = arith.truncf %30 : vector<16x32xf32> to vector<16x32xbf16>
    %cst_19 = arith.constant dense<0.000000e+00> : vector<16x32xf32>
    %33 = tpu.matmul %0, %32, %cst_19 {dimension_numbers = #tpu.dot_dimension_numbers<[1], [0], [0], [1], [0, 0, 1, 1], [], []>} : vector<16x16xbf16>, vector<16x32xbf16>, vector<16x32xf32> -> vector<16x32xf32>
    %34 = arith.addf %33, %31 : vector<16x32xf32>
    %c0_20 = arith.constant 0 : index
    %c0_21 = arith.constant 0 : index
    %35 = vector.load %arg7[%c0_20, %c0_21] : memref<1x32xf32, #tpu.memory_space<vmem>>, vector<1x32xf32>
    %36 = vector.broadcast %35 : vector<1x32xf32> to vector<16x32xf32>
    %37 = arith.addf %34, %36 : vector<16x32xf32>
    %c0_22 = arith.constant 0 : index
    %c0_23 = arith.constant 0 : index
    %38 = vector.load %arg8[%c0_22, %c0_23] : memref<16x2xf32, #tpu.memory_space<vmem>>, vector<16x2xf32>
    %39 = vector.extract_strided_slice %38 {offsets = [0, 0], sizes = [16, 1], strides = [1, 1]} : vector<16x2xf32> to vector<16x1xf32>
    %40 = vector.broadcast %39 : vector<16x1xf32> to vector<16x32xf32>
    %41 = arith.addf %37, %40 : vector<16x32xf32>
    %cst_24 = arith.constant dense<0xFF800000> : vector<32xf32>
    %42 = vector.multi_reduction <maximumf>, %41, %cst_24 [0] : vector<16x32xf32> to vector<32xf32>
    %c0_25 = arith.constant 0 : index
    %c0_26 = arith.constant 0 : index
    %43 = vector.load %arg12[%c0_25, %c0_26] : memref<2x32xf32, #tpu.memory_space<vmem>>, vector<1x32xf32>
    %44 = vector.shape_cast %43 : vector<1x32xf32> to vector<32xf32>
    %45 = vector.shape_cast %42 : vector<32xf32> to vector<1x32xf32>
    tpu.vector_store %arg12[%c0_25, %c0_26], %45 {strides = array<i32>} : memref<2x32xf32, #tpu.memory_space<vmem>>, vector<1x32xf32>,
    %46 = vector.extract_strided_slice %38 {offsets = [0, 1], sizes = [16, 1], strides = [1, 1]} : vector<16x2xf32> to vector<16x1xf32>
    %47 = vector.broadcast %46 : vector<16x1xf32> to vector<16x32xf32>
    %48 = arith.addf %37, %47 : vector<16x32xf32>
    %cst_27 = arith.constant dense<0xFF800000> : vector<32xf32>
    %49 = vector.multi_reduction <maximumf>, %48, %cst_27 [0] : vector<16x32xf32> to vector<32xf32>
    %c1 = arith.constant 1 : index
    %c0_28 = arith.constant 0 : index
    %50 = vector.load %arg12[%c1, %c0_28] : memref<2x32xf32, #tpu.memory_space<vmem>>, vector<1x32xf32>
    %51 = vector.shape_cast %50 : vector<1x32xf32> to vector<32xf32>
    %52 = vector.shape_cast %49 : vector<32xf32> to vector<1x32xf32>
    tpu.vector_store %arg12[%c1, %c0_28], %52 {strides = array<i32>} : memref<2x32xf32, #tpu.memory_space<vmem>>, vector<1x32xf32>,
    %c0_29 = arith.constant 0 : index
    %c0_30 = arith.constant 0 : index
    %53 = vector.load %arg12[%c0_29, %c0_30] : memref<2x32xf32, #tpu.memory_space<vmem>>, vector<2x32xf32>
    %c0_31 = arith.constant 0 : index
    %c0_32 = arith.constant 0 : index
    %54 = vector.load %arg9[%c0_31, %c0_32] : memref<32x11xf32, #tpu.memory_space<vmem>>, vector<32x11xf32>
    %cst_33 = arith.constant dense<0.000000e+00> : vector<2x11xf32>
    %55 = tpu.matmul %53, %54, %cst_33 {dimension_numbers = #tpu.dot_dimension_numbers<[1], [0], [0], [1], [0, 0, 1, 1], [], []>} : vector<2x32xf32>, vector<32x11xf32>, vector<2x11xf32> -> vector<2x11xf32>
    %c0_34 = arith.constant 0 : index
    %c0_35 = arith.constant 0 : index
    %56 = vector.load %arg10[%c0_34, %c0_35] : memref<1x11xf32, #tpu.memory_space<vmem>>, vector<1x11xf32>
    %57 = vector.broadcast %56 : vector<1x11xf32> to vector<2x11xf32>
    %58 = arith.addf %55, %57 : vector<2x11xf32>
    %c0_36 = arith.constant 0 : index
    %c0_37 = arith.constant 0 : index
    %59 = vector.load %arg11[%c0_36, %c0_37] : memref<2x11xf32, #tpu.memory_space<vmem>>, vector<2x11xf32>
    tpu.vector_store %arg11[%c0_36, %c0_37], %58 {strides = array<i32>} : memref<2x11xf32, #tpu.memory_space<vmem>>, vector<2x11xf32>,
    return
  }
}

</mosaic_0001>

<bundles_post_ra>
// kernel: gcn_forward_fused.1
= control target key start
LH: loop header
LB: loop body
LE: loop exit
PB: predicated region body
PF: predicated region fallthrough
CT: control target
= control target key end

     0   :  { %s1463_s0 = inlined_call_operand.vmem [shape: bf16[16,16], index: 0, kind: input, shape index: {}]   ;;  %s1464_s1 = inlined_call_operand.vmem [shape: bf16[16,768], index: 1, kind: input, shape index: {}]   ;;  %s1465_s2 = inlined_call_operand.vmem [shape: bf16[768,64], index: 2, kind: input, shape index: {}]   ;;  %s1466_s3 = inlined_call_operand.vmem [shape: f32[1,32], index: 3, kind: input, shape index: {}]   ;;  %s1467_s4 = inlined_call_operand.vmem [shape: bf16[32,64], index: 4, kind: input, shape index: {}]   ;;  %s1468_s5 = inlined_call_operand.vmem [shape: f32[1,32], index: 5, kind: input, shape index: {}]   ;;  %s1469_s6 = inlined_call_operand.vmem [shape: bf16[32,64], index: 6, kind: input, shape index: {}]   ;;  %s1470_s7 = inlined_call_operand.vmem [shape: f32[1,32], index: 7, kind: input, shape index: {}]   ;;  %s1471_s8 = inlined_call_operand.vmem [shape: f32[16,2], index: 8, kind: input, shape index: {}]   ;;  %s1472_s9 = inlined_call_operand.vmem [shape: f32[32,11], index: 9, kind: input, shape index: {}]   ;;  %s1473_s10 = inlined_call_operand.vmem [shape: f32[1,11], index: 10, kind: input, shape index: {}]   ;;  %s1474_s11 = inlined_call_operand.hbm [shape: f32[2,11], index: 11, kind: output, shape index: {}]  }
   0x1   :  { %v1066_v0 = vld [vmem:[%s1465_s2 + $0x38] sm:$0xff]  ;;  %v1065_v4 = vld [vmem:[%s1465_s2 + $0x30] sm:$0xff]  ;;  %v1064_v8 = vld [vmem:[%s1465_s2 + $0x28] sm:$0xff] }
   0x2   :  { %v1074_v1 = vld [vmem:[%s1465_s2 + $0x78] sm:$0xff]  ;;  %462 = vmatpush.bf16.msra.mxu0 %v1066_v0  ;;  %v1073_v5 = vld [vmem:[%s1465_s2 + $0x70] sm:$0xff]  ;;  %v1072_v9 = vld [vmem:[%s1465_s2 + $0x68] sm:$0xff] }
   0x3   :  { %v1082_v2 = vld [vmem:[%s1465_s2 + $0xb8] sm:$0xff]  ;;  %476 = vmatpush.bf16.msra.mxu1 %v1074_v1  ;;  %v1081_v6 = vld [vmem:[%s1465_s2 + $0xb0] sm:$0xff]  ;;  %v1080_v10 = vld [vmem:[%s1465_s2 + $0xa8] sm:$0xff] }
   0x4   :  { %v1090_v3 = vld [vmem:[%s1465_s2 + $0xf8] sm:$0xff]  ;;  %490 = vmatpush.bf16.msra.mxu2 %v1082_v2  ;;  %v1089_v7 = vld [vmem:[%s1465_s2 + $0xf0] sm:$0xff]  ;;  %v1088_v11 = vld [vmem:[%s1465_s2 + $0xe8] sm:$0xff] }
   0x5   :  { %504 = vmatpush.bf16.msra.mxu3 %v1090_v3  ;;  %v1063_v12 = vld [vmem:[%s1465_s2 + $0x20] sm:$0xff]  ;;  %v1062_v16 = vld [vmem:[%s1465_s2 + $0x18] sm:$0xff]  ;;  %v1061_v20 = vld [vmem:[%s1465_s2 + $0x10] sm:$0xff] }
   0x6   :  { %463 = vmatpush.bf16.msra.mxu0 %v1065_v4  ;;  %v1071_v13 = vld [vmem:[%s1465_s2 + $0x60] sm:$0xff]  ;;  %v1070_v17 = vld [vmem:[%s1465_s2 + $0x58] sm:$0xff]  ;;  %v1069_v21 = vld [vmem:[%s1465_s2 + $0x50] sm:$0xff] }
   0x7   :  { %477 = vmatpush.bf16.msra.mxu1 %v1073_v5  ;;  %v1079_v14 = vld [vmem:[%s1465_s2 + $0xa0] sm:$0xff]  ;;  %v1078_v18 = vld [vmem:[%s1465_s2 + $0x98] sm:$0xff] }
   0x8   :  { %491 = vmatpush.bf16.msra.mxu2 %v1081_v6  ;;  %v1087_v15 = vld [vmem:[%s1465_s2 + $0xe0] sm:$0xff]  ;;  %v1086_v19 = vld [vmem:[%s1465_s2 + $0xd8] sm:$0xff] }
   0x9   :  { %505 = vmatpush.bf16.msra.mxu3 %v1089_v7 }
   0xa   :  { %464 = vmatpush.bf16.msra.mxu0 %v1064_v8 }
   0xb   :  { %478 = vmatpush.bf16.msra.mxu1 %v1072_v9 }
   0xc   :  { %492 = vmatpush.bf16.msra.mxu2 %v1080_v10 }
   0xd   :  { %506 = vmatpush.bf16.msra.mxu3 %v1088_v11 }
   0xe   :  { %465 = vmatpush.bf16.msra.mxu0 %v1063_v12 }
   0xf   :  { %479 = vmatpush.bf16.msra.mxu1 %v1071_v13 }
  0x10   :  { %493 = vmatpush.bf16.msra.mxu2 %v1079_v14 }
  0x11   :  { %507 = vmatpush.bf16.msra.mxu3 %v1087_v15 }
  0x12   :  { %466 = vmatpush.bf16.msra.mxu0 %v1062_v16 }
  0x13   :  { %480 = vmatpush.bf16.msra.mxu1 %v1070_v17 }
  0x14   :  { %16 = vsyncpa [#allocation4], 0  ;;  %494 = vmatpush.bf16.msra.mxu2 %v1078_v18  ;;  %v1077_v22 = vld [vmem:[%s1465_s2 + $0x90] sm:$0xff]  ;;  %v1060_v24 = vld [vmem:[%s1465_s2 + $0x8] sm:$0xff]  ;;  %vm560_vm0 = vcmask 130048   ;;  %vm603_vm1 = vcmask 261120  }
  0x15   :  { %508 = vmatpush.bf16.msra.mxu3 %v1086_v19  ;;  %v1085_v23 = vld [vmem:[%s1465_s2 + $0xd0] sm:$0xff]  ;;  %v1068_v25 = vld [vmem:[%s1465_s2 + $0x48] sm:$0xff]  ;;  %v1059_v28 = vld [vmem:[%s1465_s2] sm:$0xff]  ;;  %vm738_vm2 = vcmask 253952   ;;  %s1153_s23 = smov [#allocation3]   ;;  %s801_s27 = sshll.u32 %s1474_s11, 4  ;;  %s802_s27 = int_to_ptr.hbm [resolvable:$true] %s801_s27 }
  0x16   :  { %467 = vmatpush.bf16.msra.mxu0 %v1061_v20  ;;  %v1076_v26 = vld [vmem:[%s1465_s2 + $0x88] sm:$0xff]  ;;  %v1067_v29 = vld [vmem:[%s1465_s2 + $0x40] sm:$0xff]  ;;  %v1098_v31 = vld [vmem:[%s1465_s2 + $0x138] sm:$0xff]  ;;  %s799_s24 = sshll.u32 %s1153_s23, 4  ;;  %vm792_vm3 = vcmask 82944   ;;  %s800_s24 = int_to_ptr.vmem [resolvable:$true] %s799_s24 }
  0x17   :  { %481 = vmatpush.bf16.msra.mxu1 %v1069_v21  ;;  %v1084_v27 = vld [vmem:[%s1465_s2 + $0xc8] sm:$0xff]  ;;  %v1075_v30 = vld [vmem:[%s1465_s2 + $0x80] sm:$0xff]  ;;  %v1056_v33 = vld [vmem:[%s1464_s1 + $0x14] sm:$0xf0] }
  0x18   :  { %495 = vmatpush.bf16.msra.mxu2 %v1077_v22  ;;  %v812_v32 = vld [vmem:[%s1464_s1] sm:$0xf]  ;;  %v1053_v34 = vld [vmem:[%s1464_s1 + $0x4] sm:$0xf]  ;;  %v814_v35 = vld [vmem:[%s1464_s1 + $0x18] sm:$0xf0] }
  0x19   :  { %509 = vmatpush.bf16.msra.mxu3 %v1085_v23  ;;  %v1106_v36 = vld [vmem:[%s1465_s2 + $0x178] sm:$0xff]  ;;  %v820_v37 = vld [vmem:[%s1464_s1 + $0x8] sm:$0xf]  ;;  %v1057_v38 = vld [vmem:[%s1464_s1 + $0x1c] sm:$0xf0]  ;;  %v813_v42 = vor.u32 %v1056_v33, %v812_v32  ;;  %v817_v43 = vor.u32 %v1053_v34, %v814_v35 }
  0x1a   :  { %468 = vmatpush.bf16.msra.mxu0 %v1060_v24  ;;  %v1083_v39 = vld [vmem:[%s1465_s2 + $0xc0] sm:$0xff]  ;;  %v1054_v40 = vld [vmem:[%s1464_s1 + $0xc] sm:$0xf]  ;;  %v821_v44 = vor.u32 %v1057_v38, %v820_v37  ;;  %v1097_v45 = vld [vmem:[%s1465_s2 + $0x130] sm:$0xff] }
  0x1b   :  { %482 = vmatpush.bf16.msra.mxu1 %v1068_v25  ;;  %v822_v41 = vld [vmem:[%s1464_s1 + $0x20] sm:$0xf0]  ;;  %v1105_v47 = vld [vmem:[%s1465_s2 + $0x170] sm:$0xff]  ;;  %v1096_v48 = vld [vmem:[%s1465_s2 + $0x128] sm:$0xff] }
  0x1c   :  { %496 = vmatpush.bf16.msra.mxu2 %v1076_v26  ;;  %v825_v46 = vor.u32 %v1054_v40, %v822_v41  ;;  %v1104_v49 = vld [vmem:[%s1465_s2 + $0x168] sm:$0xff]  ;;  %v1095_v50 = vld [vmem:[%s1465_s2 + $0x120] sm:$0xff]  ;;  %v1094_v52 = vld [vmem:[%s1465_s2 + $0x118] sm:$0xff] }
  0x1d   :  { %510 = vmatpush.bf16.msra.mxu3 %v1084_v27  ;;  %v1103_v51 = vld [vmem:[%s1465_s2 + $0x160] sm:$0xff]  ;;  %v1102_v53 = vld [vmem:[%s1465_s2 + $0x158] sm:$0xff]  ;;  %v1093_v54 = vld [vmem:[%s1465_s2 + $0x110] sm:$0xff] }
  0x1e   :  { %469 = vmatpush.bf16.msra.mxu0 %v1059_v28  ;;  %v1101_v55 = vld [vmem:[%s1465_s2 + $0x150] sm:$0xff]  ;;  %v1092_v56 = vld [vmem:[%s1465_s2 + $0x108] sm:$0xff]  ;;  %v1091_v58 = vld [vmem:[%s1465_s2 + $0x100] sm:$0xff] }
  0x1f   :  { %483 = vmatpush.bf16.msra.mxu1 %v1067_v29  ;;  %v1100_v57 = vld [vmem:[%s1465_s2 + $0x148] sm:$0xff]  ;;  %v828_v59 = vld [vmem:[%s1464_s1 + $0x10] sm:$0xf]  ;;  %v1099_v61 = vld [vmem:[%s1465_s2 + $0x140] sm:$0xff] }
  0x20   :  { %497 = vmatpush.bf16.msra.mxu2 %v1075_v30  ;;  %v1058_v60 = vld [vmem:[%s1464_s1 + $0x24] sm:$0xf0]  ;;  %v1055_v62 = vld [vmem:[%s1464_s1 + $0x14] sm:$0xf]  ;;  %v830_v63 = vld [vmem:[%s1464_s1 + $0x28] sm:$0xf0] }
  0x21   :  { %511 = vmatpush.bf16.msra.mxu3 %v1083_v39  ;;  %470 = vmatmul.bf16.vlgmr.msra.gmra.mxu0 %v813_v42  ;;  %v829_v0 = vor.u32 %v1058_v60, %v828_v59  ;;  %v833_v1 = vor.u32 %v1055_v62, %v830_v63  ;;  %s1150_s1 = smov 96   ;;  %v1399_v25 = vld [vmem:[%s1463_s0] sm:$0xff]  ;;  %v1108_v26 = vld [vmem:[%s1467_s4 + $0x8] sm:$0xff]  ;;  %v1151_v59 = vmov 0   ;;  %v1152_v60 = vmov 1  }
  0x22   :  { %518 = vmatpush.bf16.msrb.mxu0 %v1098_v31  ;;  %484 = vmatmul.bf16.vlgmr.msra.gmra.mxu1 %v817_v43  ;;  %v1107_v27 = vld [vmem:[%s1467_s4] sm:$0xff]  ;;  %v1110_v43 = vld [vmem:[%s1469_s6 + $0x8] sm:$0xff] }
  0x23   :  { %532 = vmatpush.bf16.msrb.mxu1 %v1106_v36  ;;  %498 = vmatmul.bf16.vlgmr.msra.gmra.mxu2 %v821_v44  ;;  %v1120_v31 = vld [vmem:[%s1466_s3] ss:$0 sm:$0xff] }
  0x24   :  { %512 = vmatmul.bf16.vlgmr.msra.gmra.mxu3 %v825_v46  ;;  %v1109_v44 = vld [vmem:[%s1469_s6] sm:$0xff]  ;;  %1116 = vset.pattern.permute.xlu1 %v1151_v59 }
  0x25   :  { %613 = vmatpush.bf16.msrb.mxu3 %v1108_v26  ;;  %1115 = vset.pattern.permute.xlu0 %v1151_v59 }
  0x26   :  { %519 = vmatpush.bf16.msrb.mxu0 %v1097_v45  ;;  %1117 = vset.pattern.permute.xlu2 %v1152_v60 }
  0x27   :  { %533 = vmatpush.bf16.msrb.mxu1 %v1105_v47 }
  0x29   :  { %614 = vmatpush.bf16.msrb.mxu3 %v1107_v27 }
  0x2a   :  { %520 = vmatpush.bf16.msrb.mxu0 %v1096_v48  ;;  %v1121_v48 = vld [vmem:[%s1468_s5] ss:$0 sm:$0xff] }
  0x2b   :  { %534 = vmatpush.bf16.msrb.mxu1 %v1104_v49 }
  0x2d   :  { %678 = vmatpush.bf16.msra.mxu3 %v1110_v43 }
  0x2e   :  { %521 = vmatpush.bf16.msrb.mxu0 %v1095_v50 }
  0x2f   :  { %535 = vmatpush.bf16.msrb.mxu1 %v1103_v51 }
  0x31   :  { %679 = vmatpush.bf16.msra.mxu3 %v1109_v44 }
  0x32   :  { %522 = vmatpush.bf16.msrb.mxu0 %v1094_v52 }
  0x33   :  { %536 = vmatpush.bf16.msrb.mxu1 %v1102_v53 }
  0x36   :  { %523 = vmatpush.bf16.msrb.mxu0 %v1093_v54 }
  0x37   :  { %537 = vmatpush.bf16.msrb.mxu1 %v1101_v55 }
  0x3a   :  { %524 = vmatpush.bf16.msrb.mxu0 %v1092_v56 }
  0x3b   :  { %538 = vmatpush.bf16.msrb.mxu1 %v1100_v57  ;;  %v716_v57 = vld [vmem:[%s1471_s8 + $0x8] sm:$0xff] }
  0x3e   :  { %525 = vmatpush.bf16.msrb.mxu0 %v1091_v58  ;;  %v715_v58 = vld [vmem:[%s1471_s8] sm:$0xff] }
  0x3f   :  { %539 = vmatpush.bf16.msrb.mxu1 %v1099_v61 }
  0x41   :  { %526 = vmatmul.bf16.vlgmr.msrb.gmra.mxu0 %v829_v0 }
  0x42   :  { %540 = vmatmul.bf16.vlgmr.msrb.gmra.mxu1 %v833_v1 }
  0x9e   :  { %v471_v2 = vpop.f32.mrf.mxu0 }
  0x9f   :  { %v485_v3 = vpop.f32.mrf.mxu1 }
  0xa0   :  { %v486_v5 = vadd.f32 %v485_v3, %v471_v2  ;;  %v764_v2 = vld [vmem:[%s1472_s9 + $0x18] sm:$0xff]  ;;  %v763_v3 = vld [vmem:[%s1472_s9 + $0x10] sm:$0xff] }
  0xa1   :  { %784 = vmatpush.msra.mxu1 %v764_v2 }
  0xa3   :  { %785 = vmatpush.msra.mxu1 %v763_v3 }
  0xa6   :  { %v499_v4 = vpop.f32.mrf.mxu2  ;;  %v473_v6 = vpop.f32.mrf.mxu0 }
  0xa7   :  { %v487_v7 = vpop.f32.mrf.mxu1  ;;  %v513_v8 = vpop.f32.mrf.mxu3  ;;  %v500_v9 = vadd.f32 %v499_v4, %v486_v5 }
  0xa8   :  { %v488_v11 = vadd.f32 %v487_v7, %v473_v6  ;;  %v762_v6 = vld [vmem:[%s1472_s9 + $0x8] sm:$0xff] }
  0xa9   :  { %v514_v10 = vadd.f32 %v513_v8, %v500_v9  ;;  %v1122_v8 = vld [vmem:[%s1470_s7] ss:$0 sm:$0xff]  ;;  %786 = vmatpush.msra.mxu1 %v762_v6 }
  0xaa   :  { %v761_v9 = vld [vmem:[%s1472_s9] sm:$0xff] }
  0xab   :  { %787 = vmatpush.msra.mxu1 %v761_v9 }
  0xae   :  { %v501_v12 = vpop.f32.mrf.mxu2 }
  0xaf   :  { %v502_v16 = vadd.f32 %v501_v12, %v488_v11  ;;  %v515_v18 = vpop.f32.mrf.mxu3 }
  0xb1   :  { %v516_v19 = vadd.f32 %v515_v18, %v502_v16 }
  0xbe   :  { %v527_v13 = vpop.f32.mrf.mxu0 }
  0xbf   :  { %v528_v14 = vadd.f32 %v527_v13, %v514_v10  ;;  %v541_v15 = vpop.f32.mrf.mxu1 }
  0xc1   :  { %v542_v17 = vadd.f32 %v541_v15, %v528_v14 }
  0xc3   :  { %554 = vrot.lane.b32.xlu0 %v542_v17, %s1150_s1 }
  0xc6   :  { %v529_v20 = vpop.f32.mrf.mxu0 }
  0xc7   :  { %v530_v21 = vadd.f32 %v529_v20, %v516_v19  ;;  %v543_v22 = vpop.f32.mrf.mxu1 }
  0xc9   :  { %v544_v23 = vadd.f32 %v543_v22, %v530_v21 }
  0xcb   :  { %556 = vrot.lane.b32.xlu0 %v544_v23, %s1150_s1  ;;  %v546_v24 = vpack.c.bf16 %v544_v23, %v542_v17 }
  0xcd   :  { %571 = vmatpush.bf16.msrb.mxu2 %v546_v24 }
  0xd0   :  { %1030 = vmatmul.msk.bf16.vlgmr.msrb.gmra.mxu2 %vm560_vm0, %v1399_v25 }
  0xd3   :  { %719 = vperm.xlu0 %1115, %v715_v58  }
  0xdb   :  { %1119 = vset.pattern.permute.xlu0 %v1152_v60 }
 0x135   :  { %v555_v28 = vpop.permute.xlu0 %554 }
 0x13d   :  { %v557_v32 = vpop.permute.xlu0 %556 }
 0x145   :  { %v720_v10 = vpop.permute.xlu0 %719 }
 0x153   :  { %v573_v29 = vpop.f32.mrf.mxu2 }
 0x154   :  { %v574_v30 = vadd.f32 %v573_v29, %v555_v28 }
 0x156   :  { %v582_v34 = vadd.f32 %v1120_v31, %v574_v30 }
 0x158   :  { %v584_v37 = vmax.f32 %v582_v34, 0.0 }
 0x15b   :  { %v575_v33 = vpop.f32.mrf.mxu2 }
 0x15c   :  { %v576_v35 = vadd.f32 %v575_v33, %v557_v32 }
 0x15e   :  { %v583_v36 = vadd.f32 %v1120_v31, %v576_v35 }
 0x160   :  { %v585_v38 = vmax.f32 %v583_v36, 0.0 }
 0x162   :  { %v586_v39 = vpack.c.bf16 %v585_v38, %v584_v37 }
 0x164   :  { %1039 = vmatmul.msk.bf16.vlgmr.msrb.gmra.mxu3 %vm603_vm1, %v586_v39 }
 0x1e7   :  { %v616_v40 = vpop.f32.mrf.mxu3 }
 0x1e8   :  { %624 = vrot.lane.b32.xlu1 %v616_v40, %s1150_s1 }
 0x1ef   :  { %v618_v41 = vpop.f32.mrf.mxu3 }
 0x1f0   :  { %v621_v42 = vpack.c.bf16 %v618_v41, %v616_v40  ;;  %626 = vrot.lane.b32.xlu1 %v618_v41, %s1150_s1  ;;  %v1123_v40 = vld [vmem:[%s1473_s10] ss:$0 sm:$0xff] }
 0x1f2   :  { %637 = vmatpush.bf16.msra.mxu2 %v621_v42 }
 0x1f5   :  { %1040 = vmatmul.msk.bf16.vlgmr.msra.gmra.mxu2 %vm560_vm0, %v1399_v25 }
 0x1f8   :  { %724 = vperm.xlu1 %1116, %v716_v57  }
 0x200   :  { %1118 = vset.pattern.permute.xlu1 %v1152_v60 }
 0x201   :  { %745 = vperm.xlu1 %1118, %v716_v57  }
 0x25a   :  { %v625_v45 = vpop.permute.xlu1 %624 }
 0x262   :  { %v627_v49 = vpop.permute.xlu1 %626 }
 0x26a   :  { %v725_v5 = vpop.permute.xlu1 %724 }
 0x273   :  { %v746_v15 = vpop.permute.xlu1 %745 }
 0x278   :  { %v639_v46 = vpop.f32.mrf.mxu2 }
 0x279   :  { %v640_v47 = vadd.f32 %v639_v46, %v625_v45 }
 0x27b   :  { %v648_v51 = vadd.f32 %v1121_v48, %v640_v47 }
 0x27d   :  { %v650_v54 = vmax.f32 %v648_v51, 0.0 }
 0x280   :  { %v641_v50 = vpop.f32.mrf.mxu2 }
 0x281   :  { %v642_v52 = vadd.f32 %v641_v50, %v627_v49 }
 0x283   :  { %v649_v53 = vadd.f32 %v1121_v48, %v642_v52 }
 0x285   :  { %v651_v55 = vmax.f32 %v649_v53, 0.0 }
 0x287   :  { %v652_v56 = vpack.c.bf16 %v651_v55, %v650_v54 }
 0x289   :  { %1049 = vmatmul.msk.bf16.vlgmr.msra.gmra.mxu3 %vm603_vm1, %v652_v56 }
 0x30c   :  { %v681_v61 = vpop.f32.mrf.mxu3 }
 0x30d   :  { %689 = vrot.lane.b32.xlu2 %v681_v61, %s1150_s1 }
 0x314   :  { %v683_v62 = vpop.f32.mrf.mxu3 }
 0x315   :  { %v686_v63 = vpack.c.bf16 %v683_v62, %v681_v61  ;;  %691 = vrot.lane.b32.xlu2 %v683_v62, %s1150_s1 }
 0x317   :  { %702 = vmatpush.bf16.msra.mxu0 %v686_v63 }
 0x31a   :  { %1050 = vmatmul.msk.bf16.vlgmr.msra.gmra.mxu0 %vm560_vm0, %v1399_v25 }
 0x31d   :  { %741 = vperm.xlu2 %1117, %v715_v58  }
 0x367   :  { %v690_v0 = vpop.permute.xlu2 %689 }
 0x36f   :  { %v692_v1 = vpop.permute.xlu2 %691 }
 0x377   :  { %v742_v12 = vpop.permute.xlu2 %741 }
 0x397   :  { %v704_v4 = vpop.f32.mrf.mxu0 }
 0x398   :  { %v705_v7 = vadd.f32 %v704_v4, %v690_v0 }
 0x39a   :  { %v713_v11 = vadd.f32 %v1122_v8, %v705_v7 }
 0x39c   :  { %v727_v16 = vadd.f32 %v720_v10, %v713_v11  ;;  %v748_v17 = vadd.f32 %v742_v12, %v713_v11 }
 0x39e   :  { %v729_v21 = vsel %vm603_vm1, %v727_v16, -inf  ;;  %v750_v22 = vsel %vm603_vm1, %v748_v17, -inf }
 0x39f   :  { %v706_v13 = vpop.f32.mrf.mxu0 }
 0x3a0   :  { %v707_v14 = vadd.f32 %v706_v13, %v692_v1 }
 0x3a2   :  { %v714_v18 = vadd.f32 %v1122_v8, %v707_v14 }
 0x3a4   :  { %v728_v19 = vadd.f32 %v725_v5, %v714_v18  ;;  %v749_v20 = vadd.f32 %v746_v15, %v714_v18 }
 0x3a6   :  { %v730_v23 = vsel %vm603_vm1, %v728_v19, -inf  ;;  %v751_v24 = vsel %vm603_vm1, %v749_v20, -inf }
 0x3a7   :  { %v731_v25 = vmax.f32 %v729_v21, %v730_v23  ;;  %v752_v26 = vmax.f32 %v750_v22, %v751_v24 }
 0x3a9   :  { %v732_v27 = vrot.slane %v731_v25, 4  ;;  %v753_v28 = vrot.slane %v752_v26, 4 }
 0x3ab   :  { %v733_v29 = vmax.f32 %v731_v25, %v732_v27  ;;  %v754_v30 = vmax.f32 %v752_v26, %v753_v28 }
 0x3ad   :  { %v734_v31 = vrot.slane %v733_v29, 2  ;;  %v755_v32 = vrot.slane %v754_v30, 2 }
 0x3af   :  { %v735_v33 = vmax.f32 %v733_v29, %v734_v31  ;;  %v756_v34 = vmax.f32 %v754_v30, %v755_v32 }
 0x3b1   :  { %v736_v35 = vrot.slane %v735_v33, 1  ;;  %v757_v36 = vrot.slane %v756_v34, 1 }
 0x3b3   :  { %v737_v37 = vmax.f32 %v735_v33, %v736_v35  ;;  %v758_v38 = vmax.f32 %v756_v34, %v757_v36 }
 0x3b5   :  { %739 = vst.msk [vmem:[#allocation2] sm:$0x1] %vm738_vm2, %v737_v37 }
 0x3b6   :  { %759 = vst.msk [vmem:[#allocation2 + $0x1] sm:$0x1] %vm738_vm2, %v758_v38 }
 0x3bd   :  { %v760_v39 = vld [vmem:[#allocation2] sm:$0x3] }
 0x3be   :  { %1051 = vmatmul.msk.f32.vlgmr.msra.gmra.mxu1 %vm603_vm1, %v760_v39 }
 0x43b   :  { %v789_v41 = vpop.f32.mrf.mxu1 }
 0x43c   :  { %v790_v42 = vadd.f32 %v1123_v40, %v789_v41 }
 0x43e   :  { %793 = vst.msk [vmem:[#allocation3] sm:$0x3] %vm792_vm3, %v790_v42 }
 0x43f   :  { %804 = dma.vmem_to_hbm [thread:$0]  %s800_s24, 32, %s802_s27, [#allocation4]  }
 0x440   :  { %1148 = dma.done.wait [#allocation4], 32  }
 0x441   :  { %1149 = vsyncadd [#allocation4], 4294967264 }
 0x442   :  { %809 = vsyncpa [#allocation4], 1 }

</bundles_post_ra>
